<compile_context>
chip_gen: v5e
topology: v5e:2x2
jax: 0.10.0
libtpu: 0.0.40
codegen_flags: <defaults>
</compile_context>

<pallas_src>
import jax
import jax.numpy as jnp
from jax.experimental import pallas as pl
from jax.experimental.pallas import tpu as pltpu


def _round_up(n, m):
    return (n + m - 1) // m * m


def _mlp_kernel(xT_ref, w1T_ref, b1_ref, w2T_ref, b2_ref, w3_ref, b3_ref, o_ref):
    # Transposed, lane-dense compute: columns = batch samples.
    xT = xT_ref[...]                                                   # (F, TB)

    # Linear(F, 10) + ReLU   (hidden padded to 16; pad rows are exactly zero)
    h1 = jnp.dot(w1T_ref[...], xT, preferred_element_type=jnp.float32) + b1_ref[...]
    h1 = jnp.maximum(h1, 0.0)                                          # (16, TB)

    # Dropout(0.2): identity at inference time.

    # Linear(10, 15) + ReLU  (padded to 16x16)
    h2 = jnp.dot(w2T_ref[...], h1, preferred_element_type=jnp.float32) + b2_ref[...]
    h2 = jnp.maximum(h2, 0.0)                                          # (16, TB)

    # Linear(15, 1): VPU elementwise mul + cross-sublane reduce (avoids a
    # 1-lane-wide MXU pass and emits the lane-dense (1, TB) result directly).
    y = jnp.sum(h2 * w3_ref[...], axis=0, keepdims=True) + b3_ref[...]  # (1, TB)

    o_ref[...] = y.astype(o_ref.dtype)


def house_predict_forward(x, params, *, tile_b=1024):
    """x: (B, F) float32. params: dict of w1,b1,w2,b2,w3,b3 (weights as (in, out))."""
    B, F = x.shape
    HP = 16  # padded hidden width (10 and 15 -> 16), keeps tiles (8,128)-friendly

    w1, b1 = params["w1"], params["b1"]
    w2, b2 = params["w2"], params["b2"]
    w3, b3 = params["w3"], params["b3"]
    H1, H2 = w1.shape[1], w2.shape[1]

    # Zero-pad weights/biases into the transposed, padded shapes used by the kernel.
    # Zero pads + ReLU(0)=0 keep the math exact.
    w1T = jnp.zeros((HP, F), jnp.float32).at[:H1, :].set(w1.T)
    b1p = jnp.zeros((HP, 1), jnp.float32).at[:H1, :].set(b1.reshape(H1, 1))
    w2T = jnp.zeros((HP, HP), jnp.float32).at[:H2, :H1].set(w2.T)
    b2p = jnp.zeros((HP, 1), jnp.float32).at[:H2, :].set(b2.reshape(H2, 1))
    w3p = jnp.zeros((HP, 1), jnp.float32).at[:H2, :].set(w3.reshape(H2, 1))
    b3p = b3.reshape(1, 1).astype(jnp.float32)

    # Lane-dense layout: batch on the 128-lane axis. Pad batch to a tile multiple.
    TB = min(tile_b, _round_up(B, 128))
    B_pad = _round_up(B, TB)
    xT = jnp.pad(x.T.astype(jnp.float32), ((0, 0), (0, B_pad - B)))

    grid = (B_pad // TB,)
    resident = lambda a: pl.BlockSpec(a.shape, lambda i: (0, 0))  # weights stay in VMEM

    yT = pl.pallas_call(
        _mlp_kernel,
        out_shape=jax.ShapeDtypeStruct((1, B_pad), jnp.float32),
        grid=grid,
        in_specs=[
            pl.BlockSpec((F, TB), lambda i: (0, i)),   # x tile: F sublanes x TB lanes
            resident(w1T), resident(b1p),
            resident(w2T), resident(b2p),
            resident(w3p), resident(b3p),
        ],
        out_specs=pl.BlockSpec((1, TB), lambda i: (0, i)),
        compiler_params=pltpu.CompilerParams(
            dimension_semantics=("parallel",)),       # shards batch axis across TCs (v7x)
    )(xT, w1T, b1p, w2T, b2p, w3p, b3p)

    return yT[:, :B].T  # back to (B, 1)


def init_params(key, in_features):
    """Deterministic init, PyTorch-style uniform(-1/sqrt(fan_in), 1/sqrt(fan_in))."""
    def linear(key, fan_in, fan_out):
        kw, kb = jax.random.split(key)
        bound = 1.0 / jnp.sqrt(jnp.float32(fan_in))
        w = jax.random.uniform(kw, (fan_in, fan_out), jnp.float32, -bound, bound)
        b = jax.random.uniform(kb, (1, fan_out), jnp.float32, -bound, bound)
        return w, b

    k1, k2, k3 = jax.random.split(key, 3)
    w1, b1 = linear(k1, in_features, 10)
    w2, b2 = linear(k2, 10, 15)
    w3, b3 = linear(k3, 15, 1)
    return {"w1": w1, "b1": b1, "w2": w2, "b2": b2, "w3": w3, "b3": b3}


def reference_forward(x, p):
    h1 = jnp.maximum(x @ p["w1"] + p["b1"], 0.0)
    h2 = jnp.maximum(h1 @ p["w2"] + p["b2"], 0.0)
    return h2 @ p["w3"] + p["b3"]


if __name__ == "__main__":
    key = jax.random.PRNGKey(0)
    kx, kp = jax.random.split(key)

    # Small shapes consistent with the module: 8 house features, batch of 8.
    batch, in_features = 8, 8
    x = jax.random.uniform(kx, (batch, in_features), jnp.float32, 0.0, 1.0)
    params = init_params(kp, in_features)

    y = house_predict_forward(x, params)
    y = jax.block_until_ready(y)
    y_ref = reference_forward(x, params)
    assert y.shape == (batch, 1)
    assert jnp.allclose(y, y_ref, atol=1e-5, rtol=1e-5)

    # Exercise a multi-step batch grid (grid > 1) with a non-tile-multiple batch.
    batch2 = 300
    x2 = jax.random.uniform(jax.random.PRNGKey(1), (batch2, in_features),
                            jnp.float32, 0.0, 1.0)
    y2 = jax.block_until_ready(house_predict_forward(x2, params, tile_b=128))
    y2_ref = reference_forward(x2, params)
    assert y2.shape == (batch2, 1)
    assert jnp.allclose(y2, y2_ref, atol=1e-5, rtol=1e-5)

    print("KERNEL_OK")
</pallas_src>

<mosaic_0001>
module attributes {stable_mosaic.version = 11 : i64} {
  func.func @_mlp_kernel(%arg0: i32, %arg1: memref<8x128xf32, #tpu.memory_space<vmem>>, %arg2: memref<16x8xf32, #tpu.memory_space<vmem>>, %arg3: memref<16x1xf32, #tpu.memory_space<vmem>>, %arg4: memref<16x16xf32, #tpu.memory_space<vmem>>, %arg5: memref<16x1xf32, #tpu.memory_space<vmem>>, %arg6: memref<16x1xf32, #tpu.memory_space<vmem>>, %arg7: memref<1x1xf32, #tpu.memory_space<vmem>>, %arg8: memref<1x128xf32, #tpu.memory_space<vmem>>) attributes {dimension_semantics = [#tpu.dimension_semantics<parallel>], iteration_bounds = array<i64: 1>, scalar_prefetch = 0 : i64, scratch_operands = 0 : i64, tpu.core_type = #tpu.core_type<tc>, window_params = [{transform_indices = @transform_0, window_bounds = array<i64: 8, 128>}, {pipeline_mode = #tpu.pipeline_mode<synchronous>, transform_indices = @transform_1, window_bounds = array<i64: 16, 8>}, {pipeline_mode = #tpu.pipeline_mode<synchronous>, transform_indices = @transform_2, window_bounds = array<i64: 16, 1>}, {pipeline_mode = #tpu.pipeline_mode<synchronous>, transform_indices = @transform_3, window_bounds = array<i64: 16, 16>}, {pipeline_mode = #tpu.pipeline_mode<synchronous>, transform_indices = @transform_4, window_bounds = array<i64: 16, 1>}, {pipeline_mode = #tpu.pipeline_mode<synchronous>, transform_indices = @transform_5, window_bounds = array<i64: 16, 1>}, {pipeline_mode = #tpu.pipeline_mode<synchronous>, transform_indices = @transform_6, window_bounds = array<i64: 1, 1>}, {transform_indices = @transform_7, window_bounds = array<i64: 1, 128>}]} {
    %c0 = arith.constant 0 : index
    %c0_0 = arith.constant 0 : index
    %0 = vector.load %arg1[%c0, %c0_0] : memref<8x128xf32, #tpu.memory_space<vmem>>, vector<8x128xf32>
    %c0_1 = arith.constant 0 : index
    %c0_2 = arith.constant 0 : index
    %1 = vector.load %arg2[%c0_1, %c0_2] : memref<16x8xf32, #tpu.memory_space<vmem>>, vector<16x8xf32>
    %cst = arith.constant dense<0.000000e+00> : vector<16x128xf32>
    %2 = tpu.matmul %1, %0, %cst {dimension_numbers = #tpu.dot_dimension_numbers<[1], [0], [0], [1], [0, 0, 1, 1], [], []>} : vector<16x8xf32>, vector<8x128xf32>, vector<16x128xf32> -> vector<16x128xf32>
    %c0_3 = arith.constant 0 : index
    %c0_4 = arith.constant 0 : index
    %3 = vector.load %arg3[%c0_3, %c0_4] : memref<16x1xf32, #tpu.memory_space<vmem>>, vector<16x1xf32>
    %4 = vector.broadcast %3 : vector<16x1xf32> to vector<16x128xf32>
    %5 = arith.addf %2, %4 : vector<16x128xf32>
    %cst_5 = arith.constant 0.000000e+00 : f32
    %6 = vector.broadcast %cst_5 : f32 to vector<16x128xf32>
    %7 = arith.maximumf %5, %6 : vector<16x128xf32>
    %c0_6 = arith.constant 0 : index
    %c0_7 = arith.constant 0 : index
    %8 = vector.load %arg4[%c0_6, %c0_7] : memref<16x16xf32, #tpu.memory_space<vmem>>, vector<16x16xf32>
    %cst_8 = arith.constant dense<0.000000e+00> : vector<16x128xf32>
    %9 = tpu.matmul %8, %7, %cst_8 {dimension_numbers = #tpu.dot_dimension_numbers<[1], [0], [0], [1], [0, 0, 1, 1], [], []>} : vector<16x16xf32>, vector<16x128xf32>, vector<16x128xf32> -> vector<16x128xf32>
    %c0_9 = arith.constant 0 : index
    %c0_10 = arith.constant 0 : index
    %10 = vector.load %arg5[%c0_9, %c0_10] : memref<16x1xf32, #tpu.memory_space<vmem>>, vector<16x1xf32>
    %11 = vector.broadcast %10 : vector<16x1xf32> to vector<16x128xf32>
    %12 = arith.addf %9, %11 : vector<16x128xf32>
    %cst_11 = arith.constant 0.000000e+00 : f32
    %13 = vector.broadcast %cst_11 : f32 to vector<16x128xf32>
    %14 = arith.maximumf %12, %13 : vector<16x128xf32>
    %c0_12 = arith.constant 0 : index
    %c0_13 = arith.constant 0 : index
    %15 = vector.load %arg6[%c0_12, %c0_13] : memref<16x1xf32, #tpu.memory_space<vmem>>, vector<16x1xf32>
    %16 = vector.broadcast %15 : vector<16x1xf32> to vector<16x128xf32>
    %17 = arith.mulf %14, %16 : vector<16x128xf32>
    %cst_14 = arith.constant dense<0.000000e+00> : vector<128xf32>
    %18 = vector.multi_reduction <add>, %17, %cst_14 [0] : vector<16x128xf32> to vector<128xf32>
    %19 = vector.shape_cast %18 : vector<128xf32> to vector<1x128xf32>
    %c0_15 = arith.constant 0 : index
    %c0_16 = arith.constant 0 : index
    %20 = vector.load %arg7[%c0_15, %c0_16] : memref<1x1xf32, #tpu.memory_space<vmem>>, vector<1x1xf32>
    %21 = vector.broadcast %20 : vector<1x1xf32> to vector<1x128xf32>
    %22 = arith.addf %19, %21 : vector<1x128xf32>
    %c0_17 = arith.constant 0 : index
    %c0_18 = arith.constant 0 : index
    %23 = vector.load %arg8[%c0_17, %c0_18] : memref<1x128xf32, #tpu.memory_space<vmem>>, vector<1x128xf32>
    tpu.vector_store %arg8[%c0_17, %c0_18], %22 {strides = array<i32>} : memref<1x128xf32, #tpu.memory_space<vmem>>, vector<1x128xf32>,
    return
  }
  func.func @transform_0(%arg0: i32) -> (i32, i32) {
    %c0_i32 = arith.constant 0 : i32
    %c0_i32_0 = arith.constant 0 : i32
    return %c0_i32, %arg0 : i32, i32
  }
  func.func @transform_1(%arg0: i32) -> (i32, i32) {
    %c0_i32 = arith.constant 0 : i32
    %c0_i32_0 = arith.constant 0 : i32
    %c0_i32_1 = arith.constant 0 : i32
    return %c0_i32, %c0_i32_0 : i32, i32
  }
  func.func @transform_2(%arg0: i32) -> (i32, i32) {
    %c0_i32 = arith.constant 0 : i32
    %c0_i32_0 = arith.constant 0 : i32
    %c0_i32_1 = arith.constant 0 : i32
    return %c0_i32, %c0_i32_0 : i32, i32
  }
  func.func @transform_3(%arg0: i32) -> (i32, i32) {
    %c0_i32 = arith.constant 0 : i32
    %c0_i32_0 = arith.constant 0 : i32
    %c0_i32_1 = arith.constant 0 : i32
    return %c0_i32, %c0_i32_0 : i32, i32
  }
  func.func @transform_4(%arg0: i32) -> (i32, i32) {
    %c0_i32 = arith.constant 0 : i32
    %c0_i32_0 = arith.constant 0 : i32
    %c0_i32_1 = arith.constant 0 : i32
    return %c0_i32, %c0_i32_0 : i32, i32
  }
  func.func @transform_5(%arg0: i32) -> (i32, i32) {
    %c0_i32 = arith.constant 0 : i32
    %c0_i32_0 = arith.constant 0 : i32
    %c0_i32_1 = arith.constant 0 : i32
    return %c0_i32, %c0_i32_0 : i32, i32
  }
  func.func @transform_6(%arg0: i32) -> (i32, i32) {
    %c0_i32 = arith.constant 0 : i32
    %c0_i32_0 = arith.constant 0 : i32
    %c0_i32_1 = arith.constant 0 : i32
    return %c0_i32, %c0_i32_0 : i32, i32
  }
  func.func @transform_7(%arg0: i32) -> (i32, i32) {
    %c0_i32 = arith.constant 0 : i32
    %c0_i32_0 = arith.constant 0 : i32
    return %c0_i32, %arg0 : i32, i32
  }
}

</mosaic_0001>

<bundles_post_ra>
// kernel: tpu_custom_call.1
= control target key start
LH: loop header
LB: loop body
LE: loop exit
PB: predicated region body
PF: predicated region fallthrough
CT: control target
= control target key end

     0   :  { %s287_s0 = inlined_call_operand.vmem [shape: f32[8,128], index: 0, kind: input, shape index: {}]   ;;  %s288_s1 = inlined_call_operand.vmem [shape: f32[16,8], index: 1, kind: input, shape index: {}]   ;;  %s289_s2 = inlined_call_operand.vmem [shape: f32[16,1], index: 2, kind: input, shape index: {}]   ;;  %s290_s3 = inlined_call_operand.vmem [shape: f32[16,16], index: 3, kind: input, shape index: {}]   ;;  %s291_s4 = inlined_call_operand.vmem [shape: f32[16,1], index: 4, kind: input, shape index: {}]   ;;  %s292_s5 = inlined_call_operand.vmem [shape: f32[16,1], index: 5, kind: input, shape index: {}]   ;;  %s293_s6 = inlined_call_operand.<no memory space> [shape: f32[1,1], index: 6, kind: input, shape index: {}]   ;;  %s294_s7 = inlined_call_operand.hbm [shape: f32[1,128], index: 7, kind: output, shape index: {}]  }
   0x1   :  { %v12_v0 = vstv %s293_s6 }
   0x2   :  { %13 = vst [vmem:[#allocation2] sm:$0x1] %v12_v0 }
   0x3   :  { %v29_v1 = vld [vmem:[%s287_s0] sm:$0xff]  ;;  %v33_v2 = vld [vmem:[%s289_s2 + $0x8] sm:$0xff]  ;;  %vm44_vm0 = vcmask 64512   ;;  %v206_v4 = vmov 0  }
   0x4   :  { %v30_v3 = vld [vmem:[%s288_s1] sm:$0xff]  ;;  %177 = vset.pattern.permute.xlu0 %v206_v4  ;;  %66 = vmatpush.msra.mxu0 %v29_v1  ;;  %v31_v5 = vld [vmem:[%s288_s1 + $0x8] sm:$0xff] }
   0x5   :  { %172 = vmatpush.msra.mxu3 %v29_v1  ;;  %41 = vperm.xlu0 %177, %v33_v2  }
   0x6   :  { %14 = vsyncpa [#allocation4], 0  ;;  %168 = vmatmul.msk.f32.vlgmr.msra.gmra.mxu0 %vm44_vm0, %v30_v3  ;;  %169 = vmatmul.msk.f32.vlgmr.msra.gmra.mxu3 %vm44_vm0, %v31_v5  ;;  %v32_v6 = vld [vmem:[%s289_s2] sm:$0xff]  ;;  %v79_v10 = vld [vmem:[%s291_s4 + $0x8] sm:$0xff]  ;;  %vm90_vm1 = vcmask 130048   ;;  %s159_s22 = sshll.u32 %s294_s7, 4  ;;  %s160_s22 = int_to_ptr.hbm [resolvable:$true] %s159_s22 }
   0x7   :  { %178 = vset.pattern.permute.xlu1 %v206_v4  ;;  %179 = vset.pattern.permute.xlu2 %v206_v4  ;;  %v78_v8 = vld [vmem:[%s291_s4] sm:$0xff]  ;;  %v123_v11 = vld [vmem:[%s292_s5 + $0x8] sm:$0xff] }
   0x8   :  { %v122_v9 = vld [vmem:[%s292_s5] sm:$0xff]  ;;  %82 = vperm.xlu1 %178, %v78_v8   ;;  %v77_v21 = vld [vmem:[%s290_s3 + $0x8] sm:$0xff] }
   0x9   :  { %v143_v7 = vld [vmem:[#allocation2] sm:$0x1]  ;;  %126 = vperm.xlu2 %179, %v122_v9  }
   0xa   :  { %v76_v20 = vld [vmem:[%s290_s3] sm:$0xff]  ;;  %s207_s3 = smov [#allocation3]  }
   0xb   :  { %s157_s5 = sshll.u32 %s207_s3, 4  ;;  %s158_s5 = int_to_ptr.vmem [resolvable:$true] %s157_s5 }
   0xd   :  { %36 = vperm.xlu0 %177, %v32_v6  }
  0x10   :  { %87 = vperm.xlu1 %178, %v79_v10  }
  0x11   :  { %131 = vperm.xlu2 %179, %v123_v11  }
  0x15   :  { %146 = vperm.xlu0 %177, %v143_v7  }
  0x63   :  { %v127_v23 = vpop.permute.xlu2 %126 }
  0x6b   :  { %v132_v31 = vpop.permute.xlu2 %131 }
  0x77   :  { %v42_v12 = vpop.permute.xlu0 %41 }
  0x7a   :  { %v83_v22 = vpop.permute.xlu1 %82 }
  0x7f   :  { %v37_v14 = vpop.permute.xlu0 %36 }
  0x82   :  { %v88_v26 = vpop.permute.xlu1 %87 }
  0x83   :  { %v68_v13 = vpop.f32.mrf.mxu0 }
  0x84   :  { %v69_v16 = vadd.f32 %v68_v13, %v37_v14 }
  0x86   :  { %v74_v19 = vmax.f32 %v69_v16, 0.0 }
  0x87   :  { %v147_v39 = vpop.permute.xlu0 %146 }
  0x88   :  { %v149_v41 = vperm.slane %v147_v39, 0 }
  0x89   :  { %v71_v15 = vpop.f32.mrf.mxu3 }
  0x8a   :  { %v72_v17 = vadd.f32 %v71_v15, %v42_v12 }
  0x8c   :  { %v75_v18 = vmax.f32 %v72_v17, 0.0 }
  0x8e   :  { %111 = vmatpush.msra.mxu1 %v75_v18  ;;  %173 = vmatpush.msra.mxu2 %v75_v18 }
  0x90   :  { %112 = vmatpush.msra.mxu1 %v74_v19  ;;  %174 = vmatpush.msra.mxu2 %v74_v19 }
  0x91   :  { %170 = vmatmul.msk.f32.vlgmr.msra.gmra.mxu1 %vm90_vm1, %v76_v20  ;;  %171 = vmatmul.msk.f32.vlgmr.msra.gmra.mxu2 %vm90_vm1, %v77_v21 }
 0x10e   :  { %v114_v24 = vpop.f32.mrf.mxu1 }
 0x10f   :  { %v115_v25 = vadd.f32 %v114_v24, %v83_v22 }
 0x111   :  { %v120_v28 = vmax.f32 %v115_v25, 0.0 }
 0x113   :  { %v134_v32 = vmul.f32 %v127_v23, %v120_v28 }
 0x114   :  { %v117_v27 = vpop.f32.mrf.mxu2 }
 0x115   :  { %v118_v29 = vadd.f32 %v117_v27, %v88_v26 }
 0x117   :  { %v121_v30 = vmax.f32 %v118_v29, 0.0 }
 0x119   :  { %v135_v33 = vmul.f32 %v132_v31, %v121_v30 }
 0x11b   :  { %v136_v34 = vadd.f32 %v135_v33, %v134_v32 }
 0x11d   :  { %v137_v35 = vrot.slane %v136_v34, 4 }
 0x11f   :  { %v138_v36 = vadd.f32 %v137_v35, %v136_v34 }
 0x121   :  { %v139_v37 = vrot.slane %v138_v36, 2 }
 0x123   :  { %v140_v38 = vadd.f32 %v139_v37, %v138_v36 }
 0x125   :  { %v141_v40 = vrot.slane %v140_v38, 1 }
 0x127   :  { %v142_v42 = vadd.f32 %v141_v40, %v140_v38 }
 0x129   :  { %v150_v43 = vadd.f32 %v149_v41, %v142_v42 }
 0x12b   :  { %151 = vst [vmem:[#allocation3] sm:$0x1] %v150_v43 }
 0x12c   :  { %162 = dma.vmem_to_hbm [thread:$0]  %s158_s5, 16, %s160_s22, [#allocation4]  }
 0x12d   :  { %204 = dma.done.wait [#allocation4], 16  }
 0x12e   :  { %205 = vsyncadd [#allocation4], 4294967280 }
 0x12f   :  { %167 = vsyncpa [#allocation4], 1 }

</bundles_post_ra>
